<compile_context>
chip_gen: v7x
topology: tpu7x:2x2x1
jax: 0.10.0
libtpu: 0.0.40
codegen_flags: <defaults>
</compile_context>

<pallas_src>
import math

import jax
import jax.numpy as jnp
from jax.experimental import pallas as pl
from jax.experimental.pallas import tpu as pltpu


def _token_conv_kernel(x_ref, w_ref, o_ref):
    """Circular 'same' Conv1d (k=3, no bias) for one batch element, NLC layout.

    x_ref: (1, L, Cin)   unpadded input rows (circular wrap done in-kernel)
    w_ref: (3, Cin, Cout) conv taps, pre-transposed to (tap, cin, cout)
    o_ref: (1, L, Cout)
    """
    L = o_ref.shape[1]
    x = x_ref[0]                                              # (L, Cin) in VMEM
    # Circular neighbours: row (i-1) mod L and row (i+1) mod L.
    x_prev = jnp.concatenate([x[L - 1:L, :], x[:L - 1, :]], axis=0)
    x_next = jnp.concatenate([x[1:L, :], x[:1, :]], axis=0)
    # out[i] = x[(i-1)%L] @ w0 + x[i] @ w1 + x[(i+1)%L] @ w2   (f32 accumulate)
    acc = jnp.dot(x_prev, w_ref[0], preferred_element_type=jnp.float32)
    acc = acc + jnp.dot(x, w_ref[1], preferred_element_type=jnp.float32)
    acc = acc + jnp.dot(x_next, w_ref[2], preferred_element_type=jnp.float32)
    o_ref[0] = acc.astype(o_ref.dtype)


def token_embedding(x, weight, *, compute_dtype=None):
    """x: (B, L, c_in) float32; weight: (d_model, c_in, 3) (PyTorch Conv1d layout)."""
    B, L, cin = x.shape
    d_model = weight.shape[0]
    w = jnp.transpose(weight, (2, 1, 0))                       # (3, Cin, Cout)
    if compute_dtype is not None:            # e.g. jnp.bfloat16 MXU path on v6e/v7x
        x = x.astype(compute_dtype)
        w = w.astype(compute_dtype)
    return pl.pallas_call(
        _token_conv_kernel,
        out_shape=jax.ShapeDtypeStruct((B, L, d_model), jnp.float32),
        grid=(B,),
        in_specs=[
            pl.BlockSpec((1, L, cin), lambda b: (b, 0, 0)),
            pl.BlockSpec((3, cin, d_model), lambda b: (0, 0, 0)),
        ],
        out_specs=pl.BlockSpec((1, L, d_model), lambda b: (b, 0, 0)),
        compiler_params=pltpu.CompilerParams(
            dimension_semantics=("parallel",)),
    )(x, w)


def init_token_embedding(key, c_in, d_model):
    """nn.init.kaiming_normal_(weight, mode='fan_in', nonlinearity='leaky_relu')."""
    fan_in = c_in * 3
    gain = math.sqrt(2.0 / (1.0 + 0.01 ** 2))            # leaky_relu, slope 0.01
    std = gain / math.sqrt(fan_in)
    return std * jax.random.normal(key, (d_model, c_in, 3), jnp.float32)


def token_embedding_ref(x, weight):
    """Pure-JAX reference (same semantics, no Pallas) for a correctness check."""
    L = x.shape[1]
    xp = jnp.concatenate([x[:, -1:, :], x, x[:, :1, :]], axis=1)   # circular pad
    out = 0.0
    for k in range(3):
        out = out + jnp.einsum('blc,oc->blo', xp[:, k:k + L, :], weight[:, :, k])
    return out


if __name__ == "__main__":
    # Small, deterministic shapes: d_model a multiple of 128 so the output last
    # dim is lane-dense; L a multiple of 8 for clean sublane tiling.
    B, L, C_IN, D_MODEL = 2, 24, 7, 128

    key = jax.random.PRNGKey(0)
    kx, kw = jax.random.split(key)
    x = jax.random.normal(kx, (B, L, C_IN), jnp.float32)
    weight = init_token_embedding(kw, C_IN, D_MODEL)

    fwd = jax.jit(token_embedding)
    out = jax.block_until_ready(fwd(x, weight))

    assert out.shape == (B, L, D_MODEL), out.shape
    assert bool(jnp.all(jnp.isfinite(out)))
    ref = token_embedding_ref(x, weight)
    assert bool(jnp.allclose(out, ref, rtol=1e-5, atol=1e-5)), \
        float(jnp.max(jnp.abs(out - ref)))
    print("KERNEL_OK")
</pallas_src>

<mosaic_0001>
module attributes {stable_mosaic.version = 11 : i64} {
  func.func @_token_conv_kernel(%arg0: i32, %arg1: memref<1x24x7xf32, #tpu.memory_space<vmem>>, %arg2: memref<3x7x128xf32, #tpu.memory_space<vmem>>, %arg3: memref<1x24x128xf32, #tpu.memory_space<vmem>>) attributes {dimension_semantics = [#tpu.dimension_semantics<parallel>], iteration_bounds = array<i64: 2>, scalar_prefetch = 0 : i64, scratch_operands = 0 : i64, tpu.core_type = #tpu.core_type<tc>, window_params = [{transform_indices = @transform_0, window_bounds = array<i64: 1, 24, 7>}, {pipeline_mode = #tpu.pipeline_mode<synchronous>, transform_indices = @transform_1, window_bounds = array<i64: 3, 7, 128>}, {transform_indices = @transform_2, window_bounds = array<i64: 1, 24, 128>}]} {
    %c0 = arith.constant 0 : index
    %c0_0 = arith.constant 0 : index
    %c0_1 = arith.constant 0 : index
    %0 = vector.load %arg1[%c0, %c0_0, %c0_1] : memref<1x24x7xf32, #tpu.memory_space<vmem>>, vector<1x24x7xf32>
    %1 = vector.shape_cast %0 : vector<1x24x7xf32> to vector<24x7xf32>
    %2 = vector.extract_strided_slice %1 {offsets = [23, 0], sizes = [1, 7], strides = [1, 1]} : vector<24x7xf32> to vector<1x7xf32>
    %3 = vector.extract_strided_slice %1 {offsets = [0, 0], sizes = [23, 7], strides = [1, 1]} : vector<24x7xf32> to vector<23x7xf32>
    %4 = tpu.concatenate %2, %3 in 0 : vector<1x7xf32>, vector<23x7xf32> -> vector<24x7xf32>
    %5 = vector.extract_strided_slice %1 {offsets = [1, 0], sizes = [23, 7], strides = [1, 1]} : vector<24x7xf32> to vector<23x7xf32>
    %6 = vector.extract_strided_slice %1 {offsets = [0, 0], sizes = [1, 7], strides = [1, 1]} : vector<24x7xf32> to vector<1x7xf32>
    %7 = tpu.concatenate %5, %6 in 0 : vector<23x7xf32>, vector<1x7xf32> -> vector<24x7xf32>
    %c0_2 = arith.constant 0 : index
    %c0_3 = arith.constant 0 : index
    %c0_4 = arith.constant 0 : index
    %8 = vector.load %arg2[%c0_2, %c0_3, %c0_4] : memref<3x7x128xf32, #tpu.memory_space<vmem>>, vector<1x7x128xf32>
    %9 = vector.shape_cast %8 : vector<1x7x128xf32> to vector<7x128xf32>
    %cst = arith.constant dense<0.000000e+00> : vector<24x128xf32>
    %10 = tpu.matmul %4, %9, %cst {dimension_numbers = #tpu.dot_dimension_numbers<[1], [0], [0], [1], [0, 0, 1, 1], [], []>} : vector<24x7xf32>, vector<7x128xf32>, vector<24x128xf32> -> vector<24x128xf32>
    %c1 = arith.constant 1 : index
    %c0_5 = arith.constant 0 : index
    %c0_6 = arith.constant 0 : index
    %11 = vector.load %arg2[%c1, %c0_5, %c0_6] : memref<3x7x128xf32, #tpu.memory_space<vmem>>, vector<1x7x128xf32>
    %12 = vector.shape_cast %11 : vector<1x7x128xf32> to vector<7x128xf32>
    %cst_7 = arith.constant dense<0.000000e+00> : vector<24x128xf32>
    %13 = tpu.matmul %1, %12, %cst_7 {dimension_numbers = #tpu.dot_dimension_numbers<[1], [0], [0], [1], [0, 0, 1, 1], [], []>} : vector<24x7xf32>, vector<7x128xf32>, vector<24x128xf32> -> vector<24x128xf32>
    %14 = arith.addf %10, %13 : vector<24x128xf32>
    %c2 = arith.constant 2 : index
    %c0_8 = arith.constant 0 : index
    %c0_9 = arith.constant 0 : index
    %15 = vector.load %arg2[%c2, %c0_8, %c0_9] : memref<3x7x128xf32, #tpu.memory_space<vmem>>, vector<1x7x128xf32>
    %16 = vector.shape_cast %15 : vector<1x7x128xf32> to vector<7x128xf32>
    %cst_10 = arith.constant dense<0.000000e+00> : vector<24x128xf32>
    %17 = tpu.matmul %7, %16, %cst_10 {dimension_numbers = #tpu.dot_dimension_numbers<[1], [0], [0], [1], [0, 0, 1, 1], [], []>} : vector<24x7xf32>, vector<7x128xf32>, vector<24x128xf32> -> vector<24x128xf32>
    %18 = arith.addf %14, %17 : vector<24x128xf32>
    %c0_11 = arith.constant 0 : index
    %c0_12 = arith.constant 0 : index
    %c0_13 = arith.constant 0 : index
    %19 = vector.load %arg3[%c0_11, %c0_12, %c0_13] : memref<1x24x128xf32, #tpu.memory_space<vmem>>, vector<1x24x128xf32>
    %20 = vector.shape_cast %19 : vector<1x24x128xf32> to vector<24x128xf32>
    %21 = vector.shape_cast %18 : vector<24x128xf32> to vector<1x24x128xf32>
    tpu.vector_store %arg3[%c0_11, %c0_12, %c0_13], %21 {strides = array<i32>} : memref<1x24x128xf32, #tpu.memory_space<vmem>>, vector<1x24x128xf32>,
    return
  }
  func.func @transform_0(%arg0: i32) -> (i32, i32, i32) {
    %c0_i32 = arith.constant 0 : i32
    %c0_i32_0 = arith.constant 0 : i32
    %c0_i32_1 = arith.constant 0 : i32
    return %arg0, %c0_i32, %c0_i32_0 : i32, i32, i32
  }
  func.func @transform_1(%arg0: i32) -> (i32, i32, i32) {
    %c0_i32 = arith.constant 0 : i32
    %c0_i32_0 = arith.constant 0 : i32
    %c0_i32_1 = arith.constant 0 : i32
    %c0_i32_2 = arith.constant 0 : i32
    return %c0_i32, %c0_i32_0, %c0_i32_1 : i32, i32, i32
  }
  func.func @transform_2(%arg0: i32) -> (i32, i32, i32) {
    %c0_i32 = arith.constant 0 : i32
    %c0_i32_0 = arith.constant 0 : i32
    %c0_i32_1 = arith.constant 0 : i32
    return %arg0, %c0_i32, %c0_i32_0 : i32, i32, i32
  }
}

</mosaic_0001>

<bundles_post_ra>
// kernel: token_embedding.1
= control target key start
LH: loop header
LB: loop body
LE: loop exit
PB: predicated region body
PF: predicated region fallthrough
CT: control target
= control target key end

     0   :  { %7 = vsyncpa [#allocation3], 0  ;;  %s871_s0 = inlined_call_operand.vmem [shape: f32[2,24,7], index: 0, kind: input, shape index: {}]   ;;  %s872_s1 = inlined_call_operand.vmem [shape: f32[3,7,128], index: 1, kind: input, shape index: {}]   ;;  %s873_s2 = inlined_call_operand.hbm [shape: f32[2,24,128], index: 2, kind: output, shape index: {}]  }
   0x1   :  { %9 = vsyncpa [#allocation3 + $0x1], 0  ;;  %s731_s9 = smov 0   ;;  %s733_s10 = smov 0  }
   0x2   :  { %s735_s11 = smov 0   ;;  %s737_s12 = smov 0  }
   0x3 LB: > { %s752_s13 = sadd.s32 4294967295, %s709_s12   ;;  %s523_s14 = sadd.s32 4294967294, %s709_s12   ;;  %s709_s12 = sphi %s737_s12, %s879_s12   ;;  %s705_s11 = sphi %s735_s11, %s878_s11   ;;  %s701_s10 = sphi %s733_s10, %s877_s10   ;;  %s697_s9 = sphi %s731_s9, %s876_s9  }
   0x4   : > { %s756_s15 = sadd.s32 1, %s709_s12   ;;  %s69_s16 = sadd.s32 1, %s705_s11 }
   0x5   : > { %s66_s17 = ssub.s32 %s709_s12, %s756_s15  ;;  %p79_p0 = scmp.ne.s32.totalorder %s705_s11, %s701_s10 }
   0x6   : > { %p67_p1 = scmp.eq.s32.totalorder %s66_s17, 0  ;;  %p80_p2 = scmp.eq.s32.totalorder %s752_s13, 1 }
   0x7   : > { %p85_p3 = scmp.ne.s32.totalorder %s701_s10, %s697_s9  ;;  %p86_p4 = scmp.eq.s32.totalorder %s523_s14, 1 }
   0x8   : > { %s767_s18 = scalar_select %p67_p1, %s705_s11, %s69_s16  }
   0x9   : > { %p769_p5 = por %p80_p2, %p79_p0  ;;  %p773_p6 = por %p86_p4, %p85_p3 }
   0xa   : > { %p526_p7 = scmp.ge.s32.totalorder %s709_s12, 1  ;;  %p115_p8 = scmp.lt.s32.totalorder %s709_s12, 3 }
   0xc   : > { %p116_p9 = pnand %p526_p7, %p115_p8 }
   0xd   : > { %vm157_vm0 = vcmask (!%p116_p9), 1046528   ;;  %v528_v0 = vld [vmem:[%s872_s1 + $0x8] sm:$0x7f] (!%p116_p9)  ;;  %p137_p10 = scmp.lt.s32.totalorder (!%p116_p9), %s752_s13, 1  ;;  %v711_v1 = vmov (!%p116_p9), 0.0   ;;  %vm712_vm1 = vmmov (!%p116_p9), 0  }
   0xe   : > { %119 = sbr.rel (%p116_p9) target bundleno = 275 (0x113), region = 28  ;;  %557 = vmatprep.subr.mxu1 (!%p116_p9), %v711_v1  ;;  %559 = vmatprep.mubr.msk.f32.mxu1 (!%p116_p9), %vm712_vm1, %v711_v1  ;;  %v166_v2 = vld [vmem:[%s872_s1] sm:$0x7f] (!%p116_p9)  ;;  %vm169_vm2 = vcmask (!%p116_p9), 56320   ;;  %vm150_vm3 = vcmask (!%p116_p9), 1040384   ;;  %s134_s4 = sand.u32 (!%p116_p9), 1, %s701_s10  }
   0xf   : > { %558 = vmatpush3.msk.msra.mxu1 (!%p116_p9), %vm157_vm0, %v528_v0  ;;  %568 = vmatprep.subr.mxu0 (!%p116_p9), %v711_v1  ;;  %v537_v7 = vld [vmem:[%s872_s1 + $0x10] sm:$0x7f] (!%p116_p9)  ;;  %s601_s5 = smul.u32 (!%p116_p9), 24, %s134_s4  ;;  %s713_s22 = smov (!%p116_p9), [#allocation2]  }
  0x10   : > { %569 = vmatpush3.msk.msra.mxu0 (!%p116_p9), %vm157_vm0, %v166_v2  ;;  %590 = vmatprep.subr.mxu1 (!%p116_p9), %v711_v1  ;;  %s603_s7 = smul.u32 (!%p116_p9), 384, %s752_s13  ;;  %s651_s23 = sshll.u32 (!%p116_p9), %s713_s22, 4  ;;  %s652_s23 = int_to_ptr.vmem [resolvable:$false] %s651_s23 }
  0x11   : > { %570 = vmatprep.mubr.msk.f32.mxu0 (!%p116_p9), %vm712_vm1, %v711_v1  ;;  %579 = vmatprep.subr.mxu0 (!%p116_p9), %v711_v1  ;;  %s136_s6 = scalar_lea.vmem (!%p116_p9), [#allocation2], %s601_s5  ;;  %s653_s24 = scalar_lea.vmem (!%p116_p9), %s652_s23, 768 }
  0x12   : > { %s461_s8 = sshll.u32 (!%p116_p9), %s136_s6, 4  ;;  %s828_s17 = scalar_lea.hbm (!%p116_p9), %s873_s2, %s603_s7  ;;  %s823_s8 = int_to_ptr.vmem [resolvable:$true] %s461_s8 }
  0x13   : > { %s647_s21 = scalar_lea.vmem (!%p116_p9), %s823_s8, 384  ;;  %p654_p0 = scmp.lt.s32.totalorder (!%p116_p9), %s823_s8, %s652_s23 }
  0x14   : > { %p648_p11 = scmp.ne.s32.totalorder (!%p116_p9), %s823_s8, %s647_s21  ;;  %p655_p1 = scmp.lt.s32.totalorder (!%p116_p9), %s653_s24, %s647_s21 }
  0x15   : > { %s138_s25 = scalar_select %p137_p10, %s752_s13, 1 }
  0x16   : > { %s830_s13 = scalar_lea.sflag [#allocation3], %s134_s4  ;;  %p649_p12 = pnand %p648_p11, %p769_p5 }
  0x17   : > { %s602_s26 = smul.u32 24, %s138_s25  ;;  %p656_p2 = por %p655_p1, %p654_p0 }
  0x18   : > { %p650_p13 = pneg %p649_p12 }
  0x19   : > { %s141_s29 = scalar_lea.vmem %s871_s0, %s602_s26 }
  0x1a   : > { %v142_v3 = vld [vmem:[%s141_s29] sm:$0xff]  ;;  %v144_v4 = vld [vmem:[%s141_s29 + $0x10] sm:$0xff]  ;;  %v143_v8 = vld [vmem:[%s141_s29 + $0x8] sm:$0xff]  ;;  %p657_p3 = pnand %p656_p2, %p650_p13 }
  0x1b   : > { %v151_v5 = vrot.slane %v142_v3, 7  ;;  %560 = vmatmul.mubr.msk.f32.vlgmr.msra.gmra.mrb[0].mxu1 %vm169_vm2, %v142_v3  ;;  %v146_v6 = vrot.slane %v144_v4, 7  ;;  %v158_v10 = vrot.slane %v142_v3, 1  ;;  %v159_v11 = vrot.slane %v143_v8, 1 }
  0x1c   : > { %562 = vmatprep.mubr.msk.f32.mxu1 %vm712_vm1, %v711_v1  ;;  %591 = vmatpush3.msk.msra.mxu1 %vm157_vm0, %v166_v2  ;;  %v152_v12 = vrot.slane %v143_v8, 7  ;;  %v161_v14 = vrot.slane %v144_v4, 1 }
  0x1d   : > { %v156_v9 = vsel %vm150_vm3, %v146_v6, %v151_v5  ;;  %v160_v13 = vsel %vm157_vm0, %v158_v10, %v159_v11 }
  0x1e   : > { %571 = vmatmul.mubr.msk.f32.vlgmr.msra.gmra.mrb[0].mxu0 %vm169_vm2, %v156_v9  ;;  %v153_v15 = vsel %vm150_vm3, %v151_v5, %v152_v12  ;;  %v162_v16 = vsel %vm157_vm0, %v159_v11, %v161_v14  ;;  %v154_v17 = vsel %vm150_vm3, %v152_v12, %v146_v6  ;;  %v165_v18 = vsel %vm157_vm0, %v161_v14, %v158_v10 }
  0x1f   : > { %580 = vmatpush3.msk.msra.mxu0 %vm157_vm0, %v537_v7  ;;  %563 = vmatmul.mubr.msk.f32.gmra.mrb[2].mxu1 %vm169_vm2, %v143_v8 }
  0x20   : > { %565 = vmatprep.mubr.msk.f32.mxu1 %vm712_vm1, %v711_v1  ;;  %581 = vmatprep.mubr.msk.f32.mxu0 %vm712_vm1, %v711_v1 }
  0x23   : > { %566 = vmatmul.mubr.msk.f32.gmra.mrb[4].mxu1 %vm169_vm2, %v144_v4 }
  0x24   : > { %573 = vmatprep.mubr.msk.f32.mxu1 %vm712_vm1, %v711_v1 }
  0x26   : > { %582 = vmatmul.mubr.msk.f32.vlgmr.msra.gmra.mrb[0].mxu0 %vm169_vm2, %v160_v13 }
  0x27   : > { %574 = vmatmul.mubr.msk.f32.vlgmr.msra.gmra.mrb[2].mxu1 %vm169_vm2, %v153_v15  ;;  %584 = vmatprep.mubr.msk.f32.mxu0 %vm712_vm1, %v711_v1 }
  0x28   : > { %576 = vmatprep.mubr.msk.f32.mxu1 %vm712_vm1, %v711_v1 }
  0x2a   : > { %585 = vmatmul.mubr.msk.f32.gmra.mrb[2].mxu0 %vm169_vm2, %v162_v16 }
  0x2b   : > { %577 = vmatmul.mubr.msk.f32.gmra.mrb[4].mxu1 %vm169_vm2, %v154_v17  ;;  %587 = vmatprep.mubr.msk.f32.mxu0 %vm712_vm1, %v711_v1 }
  0x2e   : > { %588 = vmatmul.mubr.msk.f32.gmra.mrb[4].mxu0 %vm169_vm2, %v165_v18 }
  0xee   : > { %v245_v19 = vpop.f32.mrb[0].mxu1 }
  0xef   : > { %v561_v20 = vpop.f32.mrb[1].mxu1 }
  0xf9   : > { %v427_v21 = vpop.f32.mrb[0].mxu0 }
  0xfa   : > { %v592_v22 = vadd.f32 %v427_v21, %v245_v19  ;;  %v340_v23 = vpop.f32.mrb[2].mxu1  ;;  %v583_v24 = vpop.f32.mrb[1].mxu0 }
  0xfb   : > { %v575_v25 = vpop.f32.mrb[3].mxu1 }
  0xfc   : > { %444 = vst [vmem:[%s136_s6] sm:$0xff] %v592_v22 }
  0xfd   : > { %v432_v26 = vpop.f32.mrb[2].mxu0 }
  0xfe   : > { %v593_v27 = vadd.f32 %v432_v26, %v340_v23  ;;  %v345_v28 = vpop.f32.mrb[4].mxu1  ;;  %v586_v29 = vpop.f32.mrb[3].mxu0 }
  0xff   : > { %v578_v30 = vpop.f32.mrb[5].mxu1 }
 0x100   : > { %445 = vst [vmem:[%s136_s6 + $0x8] sm:$0xff] %v593_v27 }
 0x101   : > { %v437_v31 = vpop.f32.mrb[4].mxu0 }
 0x102   : > { %v594_v32 = vadd.f32 %v437_v31, %v345_v28  ;;  %v589_v33 = vpop.f32.mrb[5].mxu0 }
 0x104   : > { %446 = vst [vmem:[%s136_s6 + $0x10] sm:$0xff] %v594_v32 }
 0x105   : > { %660 = shalt.err (!%p657_p3)
}
 0x106   : > { %s661_s25 = scalar_lea.hbm %s828_s17, 384  ;;  %s665_s28 = scalar_lea.hbm %s873_s2, 768 }
 0x107   : > { %p662_p4 = scmp.ne.s32.totalorder %s828_s17, %s661_s25  ;;  %p666_p9 = scmp.lt.u32.totalorder %s828_s17, %s873_s2 }
 0x108   : > { %p667_p10 = scmp.lt.u32.totalorder %s665_s28, %s661_s25  ;;  %p669_p12 = scmp.lt.u32.totalorder %s661_s25, %s828_s17 }
 0x109   : > { %p663_p7 = pnand %p662_p4, %p769_p5 }
 0x10a   : > { %p668_p11 = por %p667_p10, %p666_p9 }
 0x10b   : > { %p664_p8 = pneg %p663_p7 }
 0x10c   : > { %p670_p13 = por %p669_p12, %p668_p11 }
 0x10e   : > { %p671_p0 = pnand %p670_p13, %p664_p8 }
 0x110   : > { %674 = shalt.err (!%p671_p0)
}
 0x111   : > { %s714_s3 = smov 128   ;;  %s715_s4 = smov 8  }
 0x112   : > { %604 = dma.vmem_to_hbm [thread:$0]  (%p769_p5), %s823_s8, 384, %s828_s17, %s830_s13, %s714_s3, %s714_s3, %s715_s4  }
 0x113 PF: > { %p610_p1 = scmp.ge.s32.totalorder %s709_s12, 2  ;;  %s476_s5 = sand.u32 1, %s697_s9  }
 0x114   : > { %s477_s6 = scalar_lea.sflag [#allocation3], %s476_s5 }
 0x115   : > { %p607_p2 = pnand %p610_p1, %p773_p6 }
 0x117   : > { %692 = dma.done.wait (!%p607_p2), %s477_s6, 384  }
 0x118   : > { %694 = vsyncadd (!%p607_p2), %s477_s6, 4294966912  ;;  %p12_p3 = scmp.ge.s32.totalorder %s756_s15, 4   ;;  %s876_s9 = smov %s701_s10 }
 0x119   : > { %s877_s10 = smov %s705_s11  ;;  %s878_s11 = smov %s767_s18 }
 0x11a   : > { %s879_s12 = smov %s756_s15  ;;  %14 = sbr.rel (!%p12_p3) target bundleno = 3 (0x3), region = 65 }
 0x121   :  { %482 = vsyncpa [#allocation3], 1 }
 0x122   :  { %484 = vsyncpa [#allocation3 + $0x1], 1 }

</bundles_post_ra>
